<compile_context>
chip_gen: v7x
topology: tpu7x:2x2x1
jax: 0.10.0
libtpu: 0.0.40
codegen_flags: <defaults>
</compile_context>

<pallas_src>
import jax
import jax.numpy as jnp
from jax.experimental import pallas as pl
from jax.experimental.pallas import tpu as pltpu


# ---------------------------------------------------------------------------
# Kernel: per-channel one-pass moment accumulation.
# ---------------------------------------------------------------------------
def _pkd_moments_kernel(s_ref, t_ref, mom_ref):
    """s_ref, t_ref: (1, Ct, HWt) blocks (native dtype).

    mom_ref: (Ct, 8) f32 accumulator; columns 0..4 hold
             sum(s), sum(s^2), sum(t), sum(t^2), sum(s*t).
    The output block index depends only on grid axis 0 (channel tile), so it
    stays resident in VMEM across the reduction axes (batch, HW tiles).
    """
    first_step = jnp.logical_and(pl.program_id(1) == 0, pl.program_id(2) == 0)

    @pl.when(first_step)
    def _():
        mom_ref[...] = jnp.zeros_like(mom_ref)

    s = s_ref[0].astype(jnp.float32)  # (Ct, HWt)
    t = t_ref[0].astype(jnp.float32)

    mom_ref[:, 0:1] += jnp.sum(s, axis=-1, keepdims=True)
    mom_ref[:, 1:2] += jnp.sum(s * s, axis=-1, keepdims=True)
    mom_ref[:, 2:3] += jnp.sum(t, axis=-1, keepdims=True)
    mom_ref[:, 3:4] += jnp.sum(t * t, axis=-1, keepdims=True)
    mom_ref[:, 4:5] += jnp.sum(s * t, axis=-1, keepdims=True)


# ---------------------------------------------------------------------------
# Tiling helpers.
# ---------------------------------------------------------------------------
def _sublane_multiple(dtype) -> int:
    itemsize = jnp.dtype(dtype).itemsize
    return {4: 8, 2: 16, 1: 32}.get(itemsize, 8)


def _pick_tile(dim: int, target: int, multiple: int) -> int:
    """Largest tile <= target that is a multiple of `multiple` and divides
    `dim`; falls back to the full dim (always a legal block size)."""
    if dim <= target:
        return dim
    t = (target // multiple) * multiple
    while t >= multiple:
        if dim % t == 0:
            return t
        t -= multiple
    return dim  # odd size: take the whole axis (may cost VMEM, always correct)


# ---------------------------------------------------------------------------
# Epilogue: turn the (C, 8) moment table into the scalar PKD loss.
# ---------------------------------------------------------------------------
def _loss_from_moments(mom, m: int, c: int, loss_weight: float):
    # NOTE: m == 1 divides by zero in the unbiased variance, matching
    # torch.Tensor.std(ddof=1) behavior on degenerate inputs.
    m_f = jnp.float32(m)
    sum_s, sum_ss = mom[:, 0], mom[:, 1]
    sum_t, sum_tt = mom[:, 2], mom[:, 3]
    sum_st = mom[:, 4]

    mean_s = sum_s / m_f
    mean_t = sum_t / m_f
    # Centered sums of squares / cross products (clamped against tiny
    # negative values from one-pass cancellation).
    css = jnp.maximum(sum_ss - m_f * mean_s * mean_s, 0.0)
    ctt = jnp.maximum(sum_tt - m_f * mean_t * mean_t, 0.0)
    cst = sum_st - m_f * mean_s * mean_t

    inv_dof = 1.0 / jnp.float32(m - 1)  # unbiased std (ddof=1), as torch
    ds = jnp.sqrt(css * inv_dof) + jnp.float32(1e-6)
    dt = jnp.sqrt(ctt * inv_dof) + jnp.float32(1e-6)

    # sum_m (norm_s - norm_t)^2 per channel, from sufficient statistics.
    per_ch = css / (ds * ds) + ctt / (dt * dt) - 2.0 * cst / (ds * dt)
    mse = jnp.sum(per_ch) / (jnp.float32(c) * m_f)
    return mse * jnp.float32(0.5) * jnp.float32(loss_weight)


# ---------------------------------------------------------------------------
# Public wrapper (forward semantics of PKDLoss.forward for NCHW tensors).
# ---------------------------------------------------------------------------
def pkd_loss(s_feat, t_feat, *, loss_weight=1.0, resize_stu=True,
             c_tile_target=256, hw_tile_target=2048):
    """s_feat, t_feat: (N, C, H, W) arrays (student / teacher features)."""
    # Spatial alignment glue (F.interpolate(..., mode='bilinear')).
    if s_feat.shape[2:] != t_feat.shape[2:]:
        if resize_stu:
            n, c = s_feat.shape[:2]
            s_feat = jax.image.resize(
                s_feat, (n, c) + t_feat.shape[2:], method="bilinear")
        else:
            n, c = t_feat.shape[:2]
            t_feat = jax.image.resize(
                t_feat, (n, c) + s_feat.shape[2:], method="bilinear")
    assert s_feat.shape == t_feat.shape

    n, c, h, w = s_feat.shape
    hw = h * w
    m = n * hw

    # Free, contiguous merges — no HBM transpose, no dtype cast.
    s3 = s_feat.reshape(n, c, hw)
    t3 = t_feat.reshape(n, c, hw)

    sub = max(_sublane_multiple(s3.dtype), _sublane_multiple(t3.dtype))
    tc = _pick_tile(c, c_tile_target, sub)
    thw = _pick_tile(hw, hw_tile_target, 128)
    grid = (c // tc, n, hw // thw)

    in_spec = pl.BlockSpec((1, tc, thw), lambda ci, ni, hi: (ni, ci, hi))
    moments = pl.pallas_call(
        _pkd_moments_kernel,
        out_shape=jax.ShapeDtypeStruct((c, 8), jnp.float32),
        grid_spec=pltpu.PrefetchScalarGridSpec(
            num_scalar_prefetch=0,
            grid=grid,
            in_specs=[in_spec, in_spec],
            out_specs=pl.BlockSpec((tc, 8), lambda ci, ni, hi: (ci, 0)),
        ),
        compiler_params=pltpu.CompilerParams(
            # Channel tiles are independent -> parallel (v7x dual TC);
            # batch / HW tiles are the reduction -> arbitrary, placed last.
            dimension_semantics=("parallel", "arbitrary", "arbitrary"),
            # Default tiles keep the pipelined footprint <= ~8 MiB (f32),
            # well inside 32 MiB on every generation incl. v7x (64 MiB phys).
            vmem_limit_bytes=32 << 20,
        ),
    )(s3, t3)

    return _loss_from_moments(moments, m, c, loss_weight)


# ---------------------------------------------------------------------------
# Pure-JAX reference (two-pass, mirrors the PyTorch module exactly).
# ---------------------------------------------------------------------------
def _pkd_loss_ref(s_feat, t_feat, *, loss_weight=1.0):
    def norm(feat):
        n_, c_, h_, w_ = feat.shape
        f = jnp.transpose(feat, (1, 0, 2, 3)).reshape(c_, -1)
        f = f.astype(jnp.float32)
        mean = jnp.mean(f, axis=-1, keepdims=True)
        std = jnp.std(f, axis=-1, keepdims=True, ddof=1)
        return (f - mean) / (std + 1e-6)

    ns, nt = norm(s_feat), norm(t_feat)
    return jnp.mean((ns - nt) ** 2) / 2.0 * loss_weight


if __name__ == "__main__":
    key = jax.random.PRNGKey(0)
    k1, k2, k3, k4, k5, k6 = jax.random.split(key, 6)

    # Test 1: small NCHW feature maps, single-tile path (grid = (1, 2, 1)).
    s1 = jax.random.normal(k1, (2, 4, 16, 16), dtype=jnp.float32)
    t1 = jax.random.normal(k2, (2, 4, 16, 16), dtype=jnp.float32)
    out1 = jax.block_until_ready(pkd_loss(s1, t1, loss_weight=1.0))
    ref1 = _pkd_loss_ref(s1, t1, loss_weight=1.0)
    assert jnp.allclose(out1, ref1, rtol=1e-4, atol=1e-5), (out1, ref1)

    # Test 2: force a multi-tile grid (2 channel tiles x 2 batch x 2 HW tiles)
    # to exercise cross-step accumulation and channel-tiled output.
    s2 = jax.random.normal(k3, (2, 16, 16, 16), dtype=jnp.float32)
    t2 = jax.random.normal(k4, (2, 16, 16, 16), dtype=jnp.float32)
    out2 = jax.block_until_ready(
        pkd_loss(s2, t2, loss_weight=0.5, c_tile_target=8, hw_tile_target=128))
    ref2 = _pkd_loss_ref(s2, t2, loss_weight=0.5)
    assert jnp.allclose(out2, ref2, rtol=1e-4, atol=1e-5), (out2, ref2)

    # Test 3: native bf16 inputs (halved HBM read traffic path).
    s3 = jax.random.normal(k5, (2, 4, 16, 16), dtype=jnp.bfloat16)
    t3 = jax.random.normal(k6, (2, 4, 16, 16), dtype=jnp.bfloat16)
    out3 = jax.block_until_ready(pkd_loss(s3, t3, loss_weight=1.0))
    ref3 = _pkd_loss_ref(s3, t3, loss_weight=1.0)
    assert jnp.allclose(out3, ref3, rtol=1e-4, atol=1e-5), (out3, ref3)

    print("KERNEL_OK")
</pallas_src>

<mosaic_0001>
module attributes {stable_mosaic.version = 11 : i64} {
  func.func @_pkd_moments_kernel(%arg0: i32, %arg1: i32, %arg2: i32, %arg3: memref<1x4x256xf32, #tpu.memory_space<vmem>>, %arg4: memref<1x4x256xf32, #tpu.memory_space<vmem>>, %arg5: memref<4x8xf32, #tpu.memory_space<vmem>>) attributes {dimension_semantics = [#tpu.dimension_semantics<parallel>, #tpu.dimension_semantics<arbitrary>, #tpu.dimension_semantics<arbitrary>], iteration_bounds = array<i64: 1, 2, 1>, scalar_prefetch = 0 : i64, scratch_operands = 0 : i64, tpu.core_type = #tpu.core_type<tc>, window_params = [{transform_indices = @transform_0, window_bounds = array<i64: 1, 4, 256>}, {transform_indices = @transform_1, window_bounds = array<i64: 1, 4, 256>}, {transform_indices = @transform_2, window_bounds = array<i64: 4, 8>}]} {
    %c0_i32 = arith.constant 0 : i32
    %0 = arith.cmpi eq, %arg1, %c0_i32 : i32
    %c0_i32_0 = arith.constant 0 : i32
    %1 = arith.cmpi eq, %arg2, %c0_i32_0 : i32
    %2 = arith.andi %0, %1 : i1
    %3 = arith.extui %2 : i1 to i32
    %c0_i32_1 = arith.constant 0 : i32
    %4 = arith.cmpi ne, %3, %c0_i32_1 : i32
    scf.if %4 {
      %cst_27 = arith.constant 0.000000e+00 : f32
      %37 = vector.broadcast %cst_27 : f32 to vector<4x8xf32>
      %c0_28 = arith.constant 0 : index
      %c0_29 = arith.constant 0 : index
      %38 = vector.load %arg5[%c0_28, %c0_29] : memref<4x8xf32, #tpu.memory_space<vmem>>, vector<4x8xf32>
      tpu.vector_store %arg5[%c0_28, %c0_29], %37 {strides = array<i32>} : memref<4x8xf32, #tpu.memory_space<vmem>>, vector<4x8xf32>,
    } else {
    }
    %c0 = arith.constant 0 : index
    %c0_2 = arith.constant 0 : index
    %c0_3 = arith.constant 0 : index
    %5 = vector.load %arg3[%c0, %c0_2, %c0_3] : memref<1x4x256xf32, #tpu.memory_space<vmem>>, vector<1x4x256xf32>
    %6 = vector.shape_cast %5 : vector<1x4x256xf32> to vector<4x256xf32>
    %c0_4 = arith.constant 0 : index
    %c0_5 = arith.constant 0 : index
    %c0_6 = arith.constant 0 : index
    %7 = vector.load %arg4[%c0_4, %c0_5, %c0_6] : memref<1x4x256xf32, #tpu.memory_space<vmem>>, vector<1x4x256xf32>
    %8 = vector.shape_cast %7 : vector<1x4x256xf32> to vector<4x256xf32>
    %c0_7 = arith.constant 0 : index
    %c0_8 = arith.constant 0 : index
    %9 = vector.load %arg5[%c0_7, %c0_8] : memref<4x8xf32, #tpu.memory_space<vmem>>, vector<4x1xf32>
    %cst = arith.constant dense<0.000000e+00> : vector<4xf32>
    %10 = vector.multi_reduction <add>, %6, %cst [1] : vector<4x256xf32> to vector<4xf32>
    %11 = vector.shape_cast %10 : vector<4xf32> to vector<4x1xf32>
    %12 = arith.addf %9, %11 : vector<4x1xf32>
    %c0_9 = arith.constant 0 : index
    %c0_10 = arith.constant 0 : index
    %13 = vector.load %arg5[%c0_9, %c0_10] : memref<4x8xf32, #tpu.memory_space<vmem>>, vector<4x1xf32>
    tpu.vector_store %arg5[%c0_9, %c0_10], %12 {strides = array<i32>} : memref<4x8xf32, #tpu.memory_space<vmem>>, vector<4x1xf32>,
    %c0_11 = arith.constant 0 : index
    %c1 = arith.constant 1 : index
    %14 = vector.load %arg5[%c0_11, %c1] : memref<4x8xf32, #tpu.memory_space<vmem>>, vector<4x1xf32>
    %15 = arith.mulf %6, %6 : vector<4x256xf32>
    %cst_12 = arith.constant dense<0.000000e+00> : vector<4xf32>
    %16 = vector.multi_reduction <add>, %15, %cst_12 [1] : vector<4x256xf32> to vector<4xf32>
    %17 = vector.shape_cast %16 : vector<4xf32> to vector<4x1xf32>
    %18 = arith.addf %14, %17 : vector<4x1xf32>
    %c0_13 = arith.constant 0 : index
    %c1_14 = arith.constant 1 : index
    %19 = vector.load %arg5[%c0_13, %c1_14] : memref<4x8xf32, #tpu.memory_space<vmem>>, vector<4x1xf32>
    tpu.vector_store %arg5[%c0_13, %c1_14], %18 {strides = array<i32>} : memref<4x8xf32, #tpu.memory_space<vmem>>, vector<4x1xf32>,
    %c0_15 = arith.constant 0 : index
    %c2 = arith.constant 2 : index
    %20 = vector.load %arg5[%c0_15, %c2] : memref<4x8xf32, #tpu.memory_space<vmem>>, vector<4x1xf32>
    %cst_16 = arith.constant dense<0.000000e+00> : vector<4xf32>
    %21 = vector.multi_reduction <add>, %8, %cst_16 [1] : vector<4x256xf32> to vector<4xf32>
    %22 = vector.shape_cast %21 : vector<4xf32> to vector<4x1xf32>
    %23 = arith.addf %20, %22 : vector<4x1xf32>
    %c0_17 = arith.constant 0 : index
    %c2_18 = arith.constant 2 : index
    %24 = vector.load %arg5[%c0_17, %c2_18] : memref<4x8xf32, #tpu.memory_space<vmem>>, vector<4x1xf32>
    tpu.vector_store %arg5[%c0_17, %c2_18], %23 {strides = array<i32>} : memref<4x8xf32, #tpu.memory_space<vmem>>, vector<4x1xf32>,
    %c0_19 = arith.constant 0 : index
    %c3 = arith.constant 3 : index
    %25 = vector.load %arg5[%c0_19, %c3] : memref<4x8xf32, #tpu.memory_space<vmem>>, vector<4x1xf32>
    %26 = arith.mulf %8, %8 : vector<4x256xf32>
    %cst_20 = arith.constant dense<0.000000e+00> : vector<4xf32>
    %27 = vector.multi_reduction <add>, %26, %cst_20 [1] : vector<4x256xf32> to vector<4xf32>
    %28 = vector.shape_cast %27 : vector<4xf32> to vector<4x1xf32>
    %29 = arith.addf %25, %28 : vector<4x1xf32>
    %c0_21 = arith.constant 0 : index
    %c3_22 = arith.constant 3 : index
    %30 = vector.load %arg5[%c0_21, %c3_22] : memref<4x8xf32, #tpu.memory_space<vmem>>, vector<4x1xf32>
    tpu.vector_store %arg5[%c0_21, %c3_22], %29 {strides = array<i32>} : memref<4x8xf32, #tpu.memory_space<vmem>>, vector<4x1xf32>,
    %c0_23 = arith.constant 0 : index
    %c4 = arith.constant 4 : index
    %31 = vector.load %arg5[%c0_23, %c4] : memref<4x8xf32, #tpu.memory_space<vmem>>, vector<4x1xf32>
    %32 = arith.mulf %6, %8 : vector<4x256xf32>
    %cst_24 = arith.constant dense<0.000000e+00> : vector<4xf32>
    %33 = vector.multi_reduction <add>, %32, %cst_24 [1] : vector<4x256xf32> to vector<4xf32>
    %34 = vector.shape_cast %33 : vector<4xf32> to vector<4x1xf32>
    %35 = arith.addf %31, %34 : vector<4x1xf32>
    %c0_25 = arith.constant 0 : index
    %c4_26 = arith.constant 4 : index
    %36 = vector.load %arg5[%c0_25, %c4_26] : memref<4x8xf32, #tpu.memory_space<vmem>>, vector<4x1xf32>
    tpu.vector_store %arg5[%c0_25, %c4_26], %35 {strides = array<i32>} : memref<4x8xf32, #tpu.memory_space<vmem>>, vector<4x1xf32>,
    return
  }
  func.func @transform_0(%arg0: i32, %arg1: i32, %arg2: i32) -> (i32, i32, i32) {
    %c0_i32 = arith.constant 0 : i32
    return %arg1, %arg0, %arg2 : i32, i32, i32
  }
  func.func @transform_1(%arg0: i32, %arg1: i32, %arg2: i32) -> (i32, i32, i32) {
    %c0_i32 = arith.constant 0 : i32
    return %arg1, %arg0, %arg2 : i32, i32, i32
  }
  func.func @transform_2(%arg0: i32, %arg1: i32, %arg2: i32) -> (i32, i32) {
    %c0_i32 = arith.constant 0 : i32
    %c0_i32_0 = arith.constant 0 : i32
    return %arg0, %c0_i32 : i32, i32
  }
}

</mosaic_0001>

<bundles_post_ra>
// kernel: tpu_custom_call.1
= control target key start
LH: loop header
LB: loop body
LE: loop exit
PB: predicated region body
PF: predicated region fallthrough
CT: control target
= control target key end

     0   :  { %7 = vsyncpa [#allocation3], 0  ;;  %s871_s0 = inlined_call_operand.hbm [shape: f32[2,4,256], index: 0, kind: input, shape index: {}]   ;;  %s872_s1 = inlined_call_operand.hbm [shape: f32[2,4,256], index: 1, kind: input, shape index: {}]   ;;  %s873_s2 = inlined_call_operand.hbm [shape: f32[4,8], index: 2, kind: output, shape index: {}]  }
   0x1   :  { %9 = vsyncpa [#allocation3 + $0x1], 0 }
   0x2   :  { %10 = vsyncpa [#allocation6], 0 }
   0x3   :  { %12 = vsyncpa [#allocation6 + $0x1], 0 }
   0x4   :  { %13 = vsyncpa [#allocation4], 0  ;;  %s663_s9 = smov 0   ;;  %s665_s10 = smov 0  }
   0x5   :  { %s667_s11 = smov 0   ;;  %s669_s12 = smov 0  }
   0x6   :  { %s671_s13 = smov 0   ;;  %s673_s14 = smov 0  }
   0x7 LB: > { %s408_s15 = sadd.s32 4294967295, %s642_s14   ;;  %s34_s16 = sadd.s32 1, %s638_s13  ;;  %s642_s14 = sphi %s673_s14, %s19_s14   ;;  %s638_s13 = sphi %s671_s13, %s888_s13   ;;  %s634_s12 = sphi %s669_s12, %s887_s12   ;;  %s630_s11 = sphi %s667_s11, %s886_s11   ;;  %s626_s10 = sphi %s665_s10, %s885_s10   ;;  %s622_s9 = sphi %s663_s9, %s884_s9  }
   0x8   : > { %p36_p0 = scmp.ge.s32.totalorder %s34_s16, 2  ;;  %s49_s17 = sadd.s32 1, %s630_s11 }
   0x9   : > { %p56_p1 = scmp.ne.s32.totalorder %s630_s11, %s626_s10  ;;  %p57_p2 = scmp.eq.s32.totalorder %s642_s14, 0 }
   0xa   : > { %s890_s16 = smov (%p36_p0, %s34_s16), 0  ;;  %p62_p4 = scmp.ne.s32.totalorder %s626_s10, %s622_s9 }
   0xb   : > { %p699_p3 = por %p57_p2, %p56_p1  ;;  %s42_s19 = ssub.s32 %s638_s13, %s890_s16 }
   0xc   : > { %p63_p5 = scmp.eq.s32.totalorder %s408_s15, 0  ;;  %p47_p6 = scmp.eq.s32.totalorder %s42_s19, 0 }
   0xd   : > { %p443_p8 = scmp.lt.s32.totalorder %s642_s14, 2  ;;  %s717_s22 = sand.u32 1, %s630_s11  }
   0xe   : > { %p708_p7 = por %p63_p5, %p62_p4  ;;  %s425_s23 = sshll.u32 %s638_s13, 7 }
   0xf   : > { %s714_s21 = scalar_select %p47_p6, %s630_s11, %s49_s17  }
  0x10   : > { %s876_s20 = scalar_select %p708_p7, 1, 0 }
  0x11   : > { %s411_s24 = sshll.u32 %s717_s22, 3  ;;  %s726_s27 = scalar_lea.hbm %s871_s0, %s425_s23 }
  0x12   : > { %s146_s28 = scalar_lea.vmem [#allocation2], %s411_s24  ;;  %p732_p9 = pnand %p443_p8, %p699_p3 }
  0x13   : > { %s158_s29 = sshll.u32 %s146_s28, 4  ;;  %s143_s3 = scalar_lea.sflag [#allocation3], %s717_s22  ;;  %s736_s29 = int_to_ptr.vmem [resolvable:$true] %s158_s29 }
  0x14   : > { %s498_s4 = scalar_lea.hbm %s726_s27, 128  ;;  %p500_p13 = pneg %p732_p9 }
  0x15   : > { %p499_p12 = scmp.ne.s32.totalorder %s726_s27, %s498_s4  ;;  %s503_s7 = scalar_lea.hbm %s871_s0, 256 }
  0x16   : > { %p504_p2 = scmp.lt.u32.totalorder %s726_s27, %s871_s0  ;;  %p505_p3 = scmp.lt.u32.totalorder %s503_s7, %s498_s4 }
  0x17   : > { %p501_p0 = pnand %p500_p13, %p499_p12  ;;  %p507_p5 = scmp.lt.u32.totalorder %s498_s4, %s726_s27 }
  0x18   : > { %p506_p4 = por %p505_p3, %p504_p2 }
  0x19   : > { %p502_p1 = pneg %p501_p0 }
  0x1a   : > { %p508_p6 = por %p507_p5, %p506_p4 }
  0x1c   : > { %p509_p8 = pnand %p508_p6, %p502_p1 }
  0x1e   : > { %512 = shalt.err (!%p509_p8)
}
  0x1f   : > { %s513_s17 = scalar_lea.vmem %s736_s29, 128  ;;  %s644_s18 = smov [#allocation2]  }
  0x20   : > { %p514_p12 = scmp.ne.s32.totalorder %s736_s29, %s513_s17  ;;  %s518_s19 = sshll.u32 %s644_s18, 4  ;;  %s519_s19 = int_to_ptr.vmem [resolvable:$false] %s518_s19 }
  0x21   : > { %s520_s25 = scalar_lea.vmem %s519_s19, 256  ;;  %p521_p11 = scmp.lt.s32.totalorder %s736_s29, %s519_s19 }
  0x22   : > { %p516_p0 = pnand %p514_p12, %p500_p13  ;;  %p522_p2 = scmp.lt.s32.totalorder %s520_s25, %s513_s17 }
  0x24   : > { %p517_p10 = pneg %p516_p0  ;;  %p523_p3 = por %p522_p2, %p521_p11 }
  0x26   : > { %p524_p4 = pnand %p523_p3, %p517_p10 }
  0x28   : > { %527 = shalt.err (!%p524_p4)
}
  0x29   : > { %439 = dma.hbm_to_vmem [thread:$0]  (!%p732_p9), %s726_s27, 128, %s736_s29, %s143_s3  }
  0x2a   : > { %p878_p1 = scmp.lt.s32.totalorder %s642_s14, 3  ;;  %p879_p5 = scmp.ge.s32.totalorder %s642_s14, 1 }
  0x2b   : > { %s779_s5 = scalar_lea.hbm %s872_s1, %s425_s23  ;;  %s169_s6 = scalar_lea.vmem [#allocation5], %s411_s24 }
  0x2c   : > { %p770_p6 = pnand %p879_p5, %p878_p1  ;;  %s181_s7 = sshll.u32 %s169_s6, 4  ;;  %s182_s7 = int_to_ptr.vmem [resolvable:$true] %s181_s7 }
  0x2d   : > { %s166_s27 = scalar_lea.sflag [#allocation6], %s717_s22  ;;  %s528_s29 = scalar_lea.hbm %s779_s5, 128 }
  0x2e   : > { %s880_s26 = scalar_select %p770_p6, 1, 0 }
  0x2f   : > { %p529_p10 = scmp.ne.s32.totalorder %s779_s5, %s528_s29  ;;  %s533_s23 = scalar_lea.hbm %s872_s1, 256 }
  0x30   : > { %p534_p12 = scmp.lt.u32.totalorder %s779_s5, %s872_s1  ;;  %p535_p0 = scmp.lt.u32.totalorder %s533_s23, %s528_s29 }
  0x31   : > { %p531_p11 = pnand %p529_p10, %p500_p13  ;;  %p537_p3 = scmp.lt.u32.totalorder %s528_s29, %s779_s5 }
  0x32   : > { %p536_p2 = por %p535_p0, %p534_p12 }
  0x33   : > { %p532_p8 = pneg %p531_p11 }
  0x34   : > { %p538_p4 = por %p537_p3, %p536_p2 }
  0x36   : > { %p539_p1 = pnand %p538_p4, %p532_p8 }
  0x38   : > { %542 = shalt.err (!%p539_p1)
}
  0x39   : > { %s543_s22 = scalar_lea.vmem %s182_s7, 128  ;;  %s645_s24 = smov [#allocation5]  }
  0x3a   : > { %p544_p5 = scmp.ne.s32.totalorder %s182_s7, %s543_s22  ;;  %s548_s18 = sshll.u32 %s645_s24, 4  ;;  %s549_s18 = int_to_ptr.vmem [resolvable:$false] %s548_s18 }
  0x3b   : > { %s550_s19 = scalar_lea.vmem %s549_s18, 256  ;;  %p551_p7 = scmp.lt.s32.totalorder %s182_s7, %s549_s18 }
  0x3c   : > { %p546_p10 = pnand %p544_p5, %p500_p13  ;;  %p552_p6 = scmp.lt.s32.totalorder %s550_s19, %s543_s22 }
  0x3e   : > { %p547_p11 = pneg %p546_p10  ;;  %p553_p0 = por %p552_p6, %p551_p7 }
  0x40   : > { %p554_p12 = pnand %p553_p0, %p547_p11 }
  0x42   : > { %557 = shalt.err (!%p554_p12)
}
  0x43   : > { %442 = dma.hbm_to_vmem [thread:$0]  (!%p732_p9), %s779_s5, 128, %s182_s7, %s166_s27  }
  0x44   : > { %p881_p8 = scmp.ne.s32.totalorder %s880_s26, 0 }
  0x45   : > { %s192_s25 = sand.u32 (!%p881_p8), 1, %s626_s10   ;;  %p882_p13 = scmp.ne.s32.totalorder (!%p881_p8), %s876_s20, 0 }
  0x46   : > { %190 = sbr.rel (%p881_p8) target bundleno = 294 (0x126), region = 28  ;;  %s418_s28 = sshll.u32 (!%p881_p8), %s192_s25, 3 }
  0x47   : > { %s193_s4 = scalar_lea.sflag (!%p881_p8), [#allocation3], %s192_s25  ;;  %s196_s6 = scalar_lea.vmem (!%p881_p8), [#allocation2], %s418_s28 }
  0x4d   : > { %609 = dma.done.wait (%p882_p13), %s193_s4, 128  }
  0x4e   : > { %611 = vsyncadd (%p882_p13), %s193_s4, 4294967168  ;;  %s202_s29 = scalar_lea.sflag [#allocation6], %s192_s25  ;;  %s205_s3 = scalar_lea.vmem [#allocation5], %s418_s28 }
  0x4f   : > { %613 = dma.done.wait (%p882_p13), %s202_s29, 128  }
  0x50   : > { %615 = vsyncadd (%p882_p13), %s202_s29, 4294967168  ;;  %p228_p7 = scmp.eq.s32.totalorder %s634_s12, 0 }
  0x51   : > { %vm234_vm0 = vcmask (%p228_p7), 60416   ;;  %v646_v0 = vmov (%p228_p7), 0.0  }
  0x52   : > { %233 = sbr.rel (!%p228_p7) target bundleno = 89 (0x59), region = 40  ;;  %235 = vst.msk [vmem:[#allocation7] sm:$0xf] (%p228_p7), %vm234_vm0, %v646_v0 }
  0x59 PF: > { %v236_v1 = vld [vmem:[%s196_s6] sm:$0xff]  ;;  %vm242_vm1 = vcmask 1043456   ;;  %v237_v2 = vld [vmem:[%s205_s3] sm:$0xff]  ;;  %vm249_vm2 = vcmask 3072   ;;  %vm262_vm3 = vcmask 11272   ;;  %vm274_vm4 = vcmask 19472  }
  0x5a   : > { %v240_v3 = vcombine.high %v236_v1, %v236_v1  ;;  %v243_v4 = vsel %vm242_vm1, %v236_v1, 0.0  ;;  %v252_v5 = vmul.f32 %v236_v1, %v236_v1  ;;  %v266_v6 = vcombine.high %v237_v2, %v237_v2  ;;  %v238_v26 = vld [vmem:[#allocation7] sm:$0xf]  ;;  %s647_s12 = smov [#allocation7]   ;;  %p827_p9 = scmp.eq.s32.totalorder %s408_s15, 1 }
  0x5b   : > { %v268_v7 = vsel %vm242_vm1, %v237_v2, 0.0  ;;  %v277_v8 = vmul.f32 %v237_v2, %v237_v2  ;;  %v290_v9 = vmul.f32 %v237_v2, %v236_v1  ;;  %vm287_vm5 = vcmask 27672   ;;  %s311_s20 = sshll.u32 %s647_s12, 4  ;;  %s312_s20 = int_to_ptr.vmem [resolvable:$true] %s311_s20 }
  0x5c   : > { %v244_v10 = vsel %vm242_vm1, %v240_v3, 0.0  ;;  %v254_v11 = vcombine.high %v252_v5, %v252_v5  ;;  %v256_v12 = vsel %vm242_vm1, %v252_v5, 0.0  ;;  %v269_v13 = vsel %vm242_vm1, %v266_v6, 0.0  ;;  %s558_s26 = scalar_lea.vmem %s312_s20, 64  ;;  %p565_p4 = scmp.lt.s32.totalorder %s312_s20, %s312_s20 }
  0x5d   : > { %v245_v14 = vadd.f32 %v244_v10, %v243_v4  ;;  %v270_v15 = vadd.f32 %v269_v13, %v268_v7  ;;  %v279_v16 = vcombine.high %v277_v8, %v277_v8  ;;  %v281_v17 = vsel %vm242_vm1, %v277_v8, 0.0  ;;  %p559_p6 = scmp.ne.s32.totalorder %s312_s20, %s558_s26  ;;  %p566_p1 = scmp.lt.s32.totalorder %s558_s26, %s558_s26 }
  0x5e   : > { %v257_v18 = vsel %vm242_vm1, %v254_v11, 0.0  ;;  %v292_v19 = vcombine.high %v290_v9, %v290_v9  ;;  %v294_v23 = vsel %vm242_vm1, %v290_v9, 0.0  ;;  %vm300_vm6 = vcmask 35872  }
  0x5f   : > { %246 = vadd.xlane.f32.xlu0 %v245_v14  ;;  %v258_v20 = vadd.f32 %v257_v18, %v256_v12  ;;  %271 = vadd.xlane.f32.xlu1 %v270_v15  ;;  %v282_v21 = vsel %vm242_vm1, %v279_v16, 0.0  ;;  %p560_p2 = pnand %p559_p6, %p827_p9  ;;  %p567_p5 = por %p566_p1, %p565_p4 }
  0x60   : > { %v283_v22 = vadd.f32 %v282_v21, %v281_v17  ;;  %v295_v24 = vsel %vm242_vm1, %v292_v19, 0.0 }
  0x61   : > { %v296_v25 = vadd.f32 %v295_v24, %v294_v23  ;;  %p561_p3 = pneg %p560_p2 }
  0x63   : > { %259 = vadd.xlane.f32.xlu0 %v258_v20  ;;  %284 = vadd.xlane.f32.xlu1 %v283_v22  ;;  %p568_p10 = pnand %p567_p5, %p561_p3 }
  0x67   : > { %297 = vadd.xlane.f32.xlu0 %v296_v25 }
  0xec   : > { %v247_v27 = vpop.xlane.xlu0 %246  ;;  %v272_v32 = vpop.xlane.xlu1 %271 }
  0xed   : > { %v248_v28 = vadd.f32 %v247_v27, %v238_v26 }
  0xef   : > { %250 = vst.msk [vmem:[#allocation7] sm:$0xf] %vm249_vm2, %v248_v28 }
  0xf0   : > { %v260_v29 = vpop.xlane.xlu0 %259  ;;  %v285_v35 = vpop.xlane.xlu1 %284 }
  0xf4   : > { %v298_v38 = vpop.xlane.xlu0 %297 }
  0xf6   : > { %v251_v30 = vld [vmem:[#allocation7] sm:$0xf] }
  0xf7   : > { %v261_v31 = vadd.f32 %v260_v29, %v251_v30 }
  0xf9   : > { %263 = vst.msk [vmem:[#allocation7] sm:$0xf] %vm262_vm3, %v261_v31 }
 0x100   : > { %v264_v33 = vld [vmem:[#allocation7] sm:$0xf] }
 0x101   : > { %v273_v34 = vadd.f32 %v272_v32, %v264_v33 }
 0x103   : > { %275 = vst.msk [vmem:[#allocation7] sm:$0xf] %vm274_vm4, %v273_v34 }
 0x10a   : > { %v276_v36 = vld [vmem:[#allocation7] sm:$0xf] }
 0x10b   : > { %v286_v37 = vadd.f32 %v285_v35, %v276_v36 }
 0x10d   : > { %288 = vst.msk [vmem:[#allocation7] sm:$0xf] %vm287_vm5, %v286_v37 }
 0x114   : > { %v289_v39 = vld [vmem:[#allocation7] sm:$0xf] }
 0x115   : > { %v299_v40 = vadd.f32 %v298_v38, %v289_v39 }
 0x117   : > { %301 = vst.msk [vmem:[#allocation7] sm:$0xf] %vm300_vm6, %v299_v40 }
 0x118   : > { %571 = shalt.err (!%p568_p10)
}
 0x119   : > { %s572_s15 = scalar_lea.hbm %s873_s2, 64 }
 0x11a   : > { %p573_p11 = scmp.ne.s32.totalorder %s873_s2, %s572_s15  ;;  %p578_p8 = scmp.lt.u32.totalorder %s572_s15, %s873_s2 }
 0x11c   : > { %p574_p0 = pnand %p573_p11, %p827_p9 }
 0x11e   : > { %p575_p12 = pneg %p574_p0 }
 0x120   : > { %p580_p13 = pnand %p578_p8, %p575_p12 }
 0x122   : > { %583 = shalt.err (!%p580_p13)
}
 0x123   : > { %433 = dma.vmem_to_hbm [thread:$0]  (%p827_p9), %s312_s20, 64, %s873_s2, [#allocation4]  }
 0x124   : > { %617 = dma.done.wait (%p827_p9), [#allocation4], 64  }
 0x125   : > { %619 = vsyncadd (%p827_p9), [#allocation4], 4294967232 }
 0x126 PF: > { %s19_s14 = sadd.s32 1, %s642_s14   ;;  %s884_s9 = smov %s626_s10 }
 0x127   : > { %p16_p7 = scmp.ge.s32.totalorder %s19_s14, 4   ;;  %s885_s10 = smov %s630_s11 }
 0x128   : > { %s886_s11 = smov %s714_s21  ;;  %s887_s12 = smov %s638_s13 }
 0x129   : > { %s888_s13 = smov %s890_s16  ;;  %18 = sbr.rel (!%p16_p7) target bundleno = 7 (0x7), region = 83 }
 0x130   :  { %324 = vsyncpa [#allocation3], 1 }
 0x131   :  { %326 = vsyncpa [#allocation3 + $0x1], 1 }
 0x132   :  { %327 = vsyncpa [#allocation6], 1 }
 0x133   :  { %329 = vsyncpa [#allocation6 + $0x1], 1 }
 0x134   :  { %330 = vsyncpa [#allocation4], 1 }
 0x135   :  { %332 = vsyncpa [#allocation4 + $0x1], 1 }

</bundles_post_ra>
